<compile_context>
chip_gen: v5e
topology: v5e:2x2
jax: 0.10.0
libtpu: 0.0.40
codegen_flags: <defaults>
</compile_context>

<pallas_src>
import jax
import jax.numpy as jnp
from jax.experimental import pallas as pl
from jax.experimental.pallas import tpu as pltpu

_LANES = 128


def _round_up(x, m):
    return ((x + m - 1) // m) * m


def _pad2(x, rows, cols):
    pr, pc = rows - x.shape[0], cols - x.shape[1]
    if pr or pc:
        x = jnp.pad(x, ((0, pr), (0, pc)))
    return x


def vnetwork_forward(obs, params, *, tile_b=256, tile_k=512,
                     matmul_dtype=jnp.bfloat16, vmem_budget=48 << 20):
    """Fused trunk(Linear->LayerNorm->Tanh) + V(Linear->ReLU->Linear->ReLU->Linear)."""
    B, repr_dim = obs.shape
    feature_dim = params["w_tr"].shape[1]
    hidden_dim = params["w1"].shape[1]

    f_pad = _round_up(feature_dim, _LANES)
    h_pad = _round_up(hidden_dim, _LANES)
    mm_bytes = jnp.dtype(matmul_dtype).itemsize
    # Sublane multiple for the packed matmul dtype (8 for f32, 16 for bf16, 32 for 8-bit).
    sub = 8 if mm_bytes >= 4 else (16 if mm_bytes == 2 else 32)

    # ---- batch tiling ----
    b_min = _round_up(B, sub)
    tile_b = _round_up(max(sub, min(tile_b, b_min)), sub)

    # ---- K (repr_dim) tiling: bounds obs/w_tr residency for large repr_dim ----
    r_align = _round_up(repr_dim, _LANES)
    tile_k = _round_up(max(_LANES, min(tile_k, r_align)), _LANES)
    r_pad = _round_up(repr_dim, tile_k)
    k_grid = r_pad // tile_k

    def vmem_est(tb, tk, kg):
        w_tr_bufs = 1 if kg == 1 else 2            # w_tr is pipelined only when K-tiled
        weights = (tk * f_pad * mm_bytes * w_tr_bufs
                   + (f_pad * h_pad + h_pad * h_pad) * mm_bytes
                   + (4 * f_pad + 3 * h_pad + _LANES) * 4)   # biases/ln/w3/b3 (single buf)
        return (weights
                + 2 * tb * tk * mm_bytes           # obs tile, double-buffered
                + 2 * tb * _LANES * 4              # out tile, double-buffered
                + tb * f_pad * 4                   # f32 accumulator scratch
                + tb * (f_pad + 2 * h_pad) * 4)    # live intermediates (h, x)

    # Shrink tiles until the working set fits the budget (v7x: 64 MiB physical/TC).
    while vmem_est(tile_b, tile_k, k_grid) > vmem_budget and tile_b > sub:
        tile_b = _round_up(tile_b // 2, sub)
    while vmem_est(tile_b, tile_k, k_grid) > vmem_budget and tile_k > _LANES:
        tile_k = _round_up(tile_k // 2, _LANES)
        r_pad = _round_up(repr_dim, tile_k)
        k_grid = r_pad // tile_k

    # v7x megacore: give the second TensorCore work when the batch is big enough.
    if b_min <= tile_b and b_min >= 2 * sub:
        tile_b = _round_up((b_min + 1) // 2, sub)

    b_pad = _round_up(B, tile_b)
    b_grid = b_pad // tile_b

    vmem_limit = int(min(max(2 * vmem_est(tile_b, tile_k, k_grid), 32 << 20), 64 << 20))

    # Zero padding keeps the math exact: padded obs columns hit zero weight rows,
    # and padded output columns of every layer get zero weights/biases, so padded
    # activations are exactly 0 through LayerNorm/tanh/ReLU.
    obs_p = _pad2(obs, b_pad, r_pad).astype(matmul_dtype)
    w_tr = _pad2(params["w_tr"], r_pad, f_pad).astype(matmul_dtype)
    b_tr = _pad2(params["b_tr"][None, :], 1, f_pad).astype(jnp.float32)
    ln_g = _pad2(params["ln_g"][None, :], 1, f_pad).astype(jnp.float32)
    ln_b = _pad2(params["ln_b"][None, :], 1, f_pad).astype(jnp.float32)
    w1 = _pad2(params["w1"], f_pad, h_pad).astype(matmul_dtype)
    b1 = _pad2(params["b1"][None, :], 1, h_pad).astype(jnp.float32)
    w2 = _pad2(params["w2"], h_pad, h_pad).astype(matmul_dtype)
    b2 = _pad2(params["b2"][None, :], 1, h_pad).astype(jnp.float32)
    w3 = _pad2(params["w3"].T, 1, h_pad).astype(jnp.float32)          # (1, h_pad) row
    b3 = jnp.broadcast_to(params["b3"].reshape(1, 1), (1, _LANES)).astype(jnp.float32)

    # Python constants baked into the jaxpr (NOT closed-over jnp arrays).
    eps = 1e-5                              # PyTorch nn.LayerNorm default
    inv_f = 1.0 / float(feature_dim)

    def kernel(obs_ref, w_tr_ref, b_tr_ref, ln_g_ref, ln_b_ref,
               w1_ref, b1_ref, w2_ref, b2_ref, w3_ref, b3_ref,
               out_ref, acc_ref):
        k = pl.program_id(1)

        # ---- trunk matmul, accumulated over repr_dim K-tiles ----
        @pl.when(k == 0)
        def _init():
            acc_ref[...] = jnp.zeros_like(acc_ref)

        acc_ref[...] += jnp.dot(obs_ref[...], w_tr_ref[...],
                                preferred_element_type=jnp.float32)

        @pl.when(k == pl.num_programs(1) - 1)
        def _finish():
            # ---- LayerNorm over the real feature_dim (lane mask), then Tanh ----
            h = acc_ref[...] + b_tr_ref[...]
            feat_mask = (jax.lax.broadcasted_iota(jnp.int32, (1, f_pad), 1)
                         < feature_dim)
            mean = jnp.sum(h, axis=-1, keepdims=True) * inv_f   # padded cols are 0
            cent = jnp.where(feat_mask, h - mean, 0.0)
            var = jnp.sum(cent * cent, axis=-1, keepdims=True) * inv_f
            hn = cent * jax.lax.rsqrt(var + eps)
            hn = hn * ln_g_ref[...] + ln_b_ref[...]
            h_act = jnp.tanh(hn)

            # ---- V head: Linear -> ReLU -> Linear -> ReLU ----
            x = jnp.dot(h_act.astype(matmul_dtype), w1_ref[...],
                        preferred_element_type=jnp.float32)
            x = jnp.maximum(x + b1_ref[...], 0.0)
            x = jnp.dot(x.astype(matmul_dtype), w2_ref[...],
                        preferred_element_type=jnp.float32)
            x = jnp.maximum(x + b2_ref[...], 0.0)

            # ---- final [hidden, 1] layer: VPU multiply + XLU lane reduce (no N=1
            # MXU push); broadcast across lanes -> unmasked lane-dense store.
            v = jnp.sum(x * w3_ref[...], axis=-1, keepdims=True)     # (tile_b, 1)
            out_ref[...] = (v + b3_ref[...]).astype(out_ref.dtype)   # (tile_b, 128)

    def const_spec(shape):
        # Index is constant across the grid -> single-buffer to halve VMEM residency.
        return pl.BlockSpec(shape, lambda i, k: (0, 0), pipeline_mode=pl.Buffered(1))

    w_tr_spec = pl.BlockSpec(
        (tile_k, f_pad), lambda i, k: (k, 0),
        pipeline_mode=pl.Buffered(1) if k_grid == 1 else None)

    out = pl.pallas_call(
        kernel,
        grid=(b_grid, k_grid),
        in_specs=[
            pl.BlockSpec((tile_b, tile_k), lambda i, k: (i, k)),  # obs (pipelined)
            w_tr_spec,                                            # w_tr K-tile
            const_spec((1, f_pad)),                               # b_tr
            const_spec((1, f_pad)),                               # ln_g
            const_spec((1, f_pad)),                               # ln_b
            const_spec((f_pad, h_pad)),                           # w1
            const_spec((1, h_pad)),                               # b1
            const_spec((h_pad, h_pad)),                           # w2
            const_spec((1, h_pad)),                               # b2
            const_spec((1, h_pad)),                               # w3 row
            const_spec((1, _LANES)),                              # b3 lane row
        ],
        out_specs=pl.BlockSpec((tile_b, _LANES), lambda i, k: (i, 0)),
        out_shape=jax.ShapeDtypeStruct((b_pad, _LANES), jnp.float32),
        scratch_shapes=[pltpu.VMEM((tile_b, f_pad), jnp.float32)],
        compiler_params=pltpu.CompilerParams(
            dimension_semantics=("parallel", "arbitrary"),  # megacore on batch axis
            vmem_limit_bytes=vmem_limit,
        ),
    )(obs_p, w_tr, b_tr, ln_g, ln_b, w1, b1, w2, b2, w3, b3)

    return out[:B, :1]


def make_params(key, repr_dim, feature_dim, hidden_dim):
    """Deterministic synthetic parameters (PyTorch-default-style Linear init)."""
    ks = jax.random.split(key, 8)

    def linear(k, fan_in, fan_out):
        bound = 1.0 / jnp.sqrt(jnp.float32(fan_in))
        return jax.random.uniform(k, (fan_in, fan_out), jnp.float32, -bound, bound)

    return {
        "w_tr": linear(ks[0], repr_dim, feature_dim),
        "b_tr": jax.random.uniform(ks[1], (feature_dim,), jnp.float32, -0.1, 0.1),
        "ln_g": jnp.ones((feature_dim,), jnp.float32),
        "ln_b": jnp.zeros((feature_dim,), jnp.float32),
        "w1": linear(ks[2], feature_dim, hidden_dim),
        "b1": jax.random.uniform(ks[3], (hidden_dim,), jnp.float32, -0.1, 0.1),
        "w2": linear(ks[4], hidden_dim, hidden_dim),
        "b2": jax.random.uniform(ks[5], (hidden_dim,), jnp.float32, -0.1, 0.1),
        "w3": linear(ks[6], hidden_dim, 1),
        "b3": jax.random.uniform(ks[7], (1,), jnp.float32, -0.1, 0.1),
    }


def vnetwork_ref(obs, p, matmul_dtype=jnp.float32):
    """Pure-JAX reference mirroring the PyTorch forward."""
    def mm(a, w):
        return jnp.dot(a.astype(matmul_dtype), w.astype(matmul_dtype),
                       preferred_element_type=jnp.float32)

    h = mm(obs, p["w_tr"]) + p["b_tr"]
    mean = jnp.mean(h, axis=-1, keepdims=True)
    var = jnp.mean((h - mean) ** 2, axis=-1, keepdims=True)
    h = (h - mean) * jax.lax.rsqrt(var + 1e-5)
    h = jnp.tanh(h * p["ln_g"] + p["ln_b"])
    x = jnp.maximum(mm(h, p["w1"]) + p["b1"], 0.0)
    x = jnp.maximum(mm(x, p["w2"]) + p["b2"], 0.0)
    return x @ p["w3"] + p["b3"]


if __name__ == "__main__":
    B, repr_dim, feature_dim, hidden_dim = 8, 32, 64, 32

    key = jax.random.PRNGKey(0)
    k_obs, k_par, k_obs2, k_obs3, k_par3 = jax.random.split(key, 5)
    obs = jax.random.normal(k_obs, (B, repr_dim), jnp.float32)
    params = make_params(k_par, repr_dim, feature_dim, hidden_dim)

    # 1) f32 matmul path, tight tolerance vs pure-JAX reference.
    v = jax.block_until_ready(vnetwork_forward(obs, params, matmul_dtype=jnp.float32))
    v_ref = vnetwork_ref(obs, params, matmul_dtype=jnp.float32)
    assert v.shape == (B, 1)
    assert jnp.allclose(v, v_ref, atol=1e-4, rtol=1e-4), (
        f"f32 mismatch: max abs err {jnp.max(jnp.abs(v - v_ref))}")

    # 2) default bf16-matmul path (MXU-native operands, f32 accumulation/LayerNorm).
    v_bf = jax.block_until_ready(vnetwork_forward(obs, params))
    v_ref_bf = vnetwork_ref(obs, params, matmul_dtype=jnp.bfloat16)
    assert jnp.allclose(v_bf, v_ref_bf, atol=5e-3, rtol=5e-2), (
        f"bf16 mismatch: max abs err {jnp.max(jnp.abs(v_bf - v_ref_bf))}")

    # 3) Multi-tile batch grid (B not a multiple of the tile, batch grid > 1).
    B2 = 300
    obs2 = jax.random.normal(k_obs2, (B2, repr_dim), jnp.float32)
    v2 = jax.block_until_ready(
        vnetwork_forward(obs2, params, tile_b=128, matmul_dtype=jnp.float32))
    v2_ref = vnetwork_ref(obs2, params, matmul_dtype=jnp.float32)
    assert v2.shape == (B2, 1)
    assert jnp.allclose(v2, v2_ref, atol=1e-4, rtol=1e-4), (
        f"grid mismatch: max abs err {jnp.max(jnp.abs(v2 - v2_ref))}")

    # 4) K-tiled repr_dim path (k grid > 1) exercising the f32 accumulator.
    repr_dim3 = 300
    obs3 = jax.random.normal(k_obs3, (48, repr_dim3), jnp.float32)
    params3 = make_params(k_par3, repr_dim3, feature_dim, hidden_dim)
    v3 = jax.block_until_ready(
        vnetwork_forward(obs3, params3, tile_b=32, tile_k=128,
                         matmul_dtype=jnp.float32))
    v3_ref = vnetwork_ref(obs3, params3, matmul_dtype=jnp.float32)
    assert v3.shape == (48, 1)
    assert jnp.allclose(v3, v3_ref, atol=1e-4, rtol=1e-4), (
        f"K-tiled mismatch: max abs err {jnp.max(jnp.abs(v3 - v3_ref))}")

    print("KERNEL_OK")
</pallas_src>

<mosaic_0001>
module attributes {stable_mosaic.version = 11 : i64} {
  func.func @kernel(%arg0: i32, %arg1: i32, %arg2: memref<8x128xf32, #tpu.memory_space<vmem>>, %arg3: memref<128x128xf32, #tpu.memory_space<vmem>>, %arg4: memref<1x128xf32, #tpu.memory_space<vmem>>, %arg5: memref<1x128xf32, #tpu.memory_space<vmem>>, %arg6: memref<1x128xf32, #tpu.memory_space<vmem>>, %arg7: memref<128x128xf32, #tpu.memory_space<vmem>>, %arg8: memref<1x128xf32, #tpu.memory_space<vmem>>, %arg9: memref<128x128xf32, #tpu.memory_space<vmem>>, %arg10: memref<1x128xf32, #tpu.memory_space<vmem>>, %arg11: memref<1x128xf32, #tpu.memory_space<vmem>>, %arg12: memref<1x128xf32, #tpu.memory_space<vmem>>, %arg13: memref<8x128xf32, #tpu.memory_space<vmem>>, %arg14: memref<8x128xf32, #tpu.memory_space<vmem>>) attributes {dimension_semantics = [#tpu.dimension_semantics<parallel>, #tpu.dimension_semantics<arbitrary>], iteration_bounds = array<i64: 1, 1>, scalar_prefetch = 0 : i64, scratch_operands = 1 : i64, tpu.core_type = #tpu.core_type<tc>, window_params = [{transform_indices = @transform_0, window_bounds = array<i64: 8, 128>}, {pipeline_mode = #tpu.pipeline_mode<synchronous>, transform_indices = @transform_1, window_bounds = array<i64: 128, 128>}, {pipeline_mode = #tpu.pipeline_mode<synchronous>, transform_indices = @transform_2, window_bounds = array<i64: 1, 128>}, {pipeline_mode = #tpu.pipeline_mode<synchronous>, transform_indices = @transform_3, window_bounds = array<i64: 1, 128>}, {pipeline_mode = #tpu.pipeline_mode<synchronous>, transform_indices = @transform_4, window_bounds = array<i64: 1, 128>}, {pipeline_mode = #tpu.pipeline_mode<synchronous>, transform_indices = @transform_5, window_bounds = array<i64: 128, 128>}, {pipeline_mode = #tpu.pipeline_mode<synchronous>, transform_indices = @transform_6, window_bounds = array<i64: 1, 128>}, {pipeline_mode = #tpu.pipeline_mode<synchronous>, transform_indices = @transform_7, window_bounds = array<i64: 128, 128>}, {pipeline_mode = #tpu.pipeline_mode<synchronous>, transform_indices = @transform_8, window_bounds = array<i64: 1, 128>}, {pipeline_mode = #tpu.pipeline_mode<synchronous>, transform_indices = @transform_9, window_bounds = array<i64: 1, 128>}, {pipeline_mode = #tpu.pipeline_mode<synchronous>, transform_indices = @transform_10, window_bounds = array<i64: 1, 128>}, {transform_indices = @transform_11, window_bounds = array<i64: 8, 128>}]} {
    %c0_i32 = arith.constant 0 : i32
    %0 = arith.cmpi eq, %arg1, %c0_i32 : i32
    %1 = arith.extui %0 : i1 to i32
    %c0_i32_0 = arith.constant 0 : i32
    %2 = arith.cmpi ne, %1, %c0_i32_0 : i32
    scf.if %2 {
      %cst_10 = arith.constant 0.000000e+00 : f32
      %12 = vector.broadcast %cst_10 : f32 to vector<8x128xf32>
      %c0_11 = arith.constant 0 : index
      %c0_12 = arith.constant 0 : index
      %13 = vector.load %arg14[%c0_11, %c0_12] : memref<8x128xf32, #tpu.memory_space<vmem>>, vector<8x128xf32>
      tpu.vector_store %arg14[%c0_11, %c0_12], %12 {strides = array<i32>} : memref<8x128xf32, #tpu.memory_space<vmem>>, vector<8x128xf32>,
    } else {
    }
    %c0 = arith.constant 0 : index
    %c0_1 = arith.constant 0 : index
    %3 = vector.load %arg14[%c0, %c0_1] : memref<8x128xf32, #tpu.memory_space<vmem>>, vector<8x128xf32>
    %c0_2 = arith.constant 0 : index
    %c0_3 = arith.constant 0 : index
    %4 = vector.load %arg2[%c0_2, %c0_3] : memref<8x128xf32, #tpu.memory_space<vmem>>, vector<8x128xf32>
    %c0_4 = arith.constant 0 : index
    %c0_5 = arith.constant 0 : index
    %5 = vector.load %arg3[%c0_4, %c0_5] : memref<128x128xf32, #tpu.memory_space<vmem>>, vector<128x128xf32>
    %cst = arith.constant dense<0.000000e+00> : vector<8x128xf32>
    %6 = tpu.matmul %4, %5, %cst {dimension_numbers = #tpu.dot_dimension_numbers<[1], [0], [0], [1], [0, 0, 1, 1], [], []>} : vector<8x128xf32>, vector<128x128xf32>, vector<8x128xf32> -> vector<8x128xf32>
    %7 = arith.addf %3, %6 : vector<8x128xf32>
    %c0_6 = arith.constant 0 : index
    %c0_7 = arith.constant 0 : index
    %8 = vector.load %arg14[%c0_6, %c0_7] : memref<8x128xf32, #tpu.memory_space<vmem>>, vector<8x128xf32>
    tpu.vector_store %arg14[%c0_6, %c0_7], %7 {strides = array<i32>} : memref<8x128xf32, #tpu.memory_space<vmem>>, vector<8x128xf32>,
    %c0_i32_8 = arith.constant 0 : i32
    %9 = arith.cmpi eq, %arg1, %c0_i32_8 : i32
    %10 = arith.extui %9 : i1 to i32
    %c0_i32_9 = arith.constant 0 : i32
    %11 = arith.cmpi ne, %10, %c0_i32_9 : i32
    scf.if %11 {
      %c0_10 = arith.constant 0 : index
      %c0_11 = arith.constant 0 : index
      %12 = vector.load %arg14[%c0_10, %c0_11] : memref<8x128xf32, #tpu.memory_space<vmem>>, vector<8x128xf32>
      %c0_12 = arith.constant 0 : index
      %c0_13 = arith.constant 0 : index
      %13 = vector.load %arg4[%c0_12, %c0_13] : memref<1x128xf32, #tpu.memory_space<vmem>>, vector<1x128xf32>
      %14 = vector.broadcast %13 : vector<1x128xf32> to vector<8x128xf32>
      %15 = arith.addf %12, %14 : vector<8x128xf32>
      %16 = tpu.iota {dimensions = array<i32: 1>} : vector<1x128xi32>
      %c64_i32 = arith.constant 64 : i32
      %17 = vector.broadcast %c64_i32 : i32 to vector<1x128xi32>
      %18 = arith.cmpi slt, %16, %17 : vector<1x128xi32>
      %cst_14 = arith.constant dense<0.000000e+00> : vector<8xf32>
      %19 = vector.multi_reduction <add>, %15, %cst_14 [1] : vector<8x128xf32> to vector<8xf32>
      %20 = vector.shape_cast %19 : vector<8xf32> to vector<8x1xf32>
      %cst_15 = arith.constant 1.562500e-02 : f32
      %21 = vector.broadcast %cst_15 : f32 to vector<8x1xf32>
      %22 = arith.mulf %20, %21 : vector<8x1xf32>
      %23 = vector.broadcast %22 : vector<8x1xf32> to vector<8x128xf32>
      %24 = arith.subf %15, %23 : vector<8x128xf32>
      %cst_16 = arith.constant 0.000000e+00 : f32
      %25 = vector.shape_cast %18 : vector<1x128xi1> to vector<1x128xi1>
      %26 = vector.broadcast %25 : vector<1x128xi1> to vector<8x128xi1>
      %27 = vector.broadcast %cst_16 : f32 to vector<8x128xf32>
      %28 = arith.select %26, %24, %27 : vector<8x128xi1>, vector<8x128xf32>
      %29 = arith.mulf %28, %28 : vector<8x128xf32>
      %cst_17 = arith.constant dense<0.000000e+00> : vector<8xf32>
      %30 = vector.multi_reduction <add>, %29, %cst_17 [1] : vector<8x128xf32> to vector<8xf32>
      %31 = vector.shape_cast %30 : vector<8xf32> to vector<8x1xf32>
      %cst_18 = arith.constant 1.562500e-02 : f32
      %32 = vector.broadcast %cst_18 : f32 to vector<8x1xf32>
      %33 = arith.mulf %31, %32 : vector<8x1xf32>
      %cst_19 = arith.constant 9.99999974E-6 : f32
      %34 = vector.broadcast %cst_19 : f32 to vector<8x1xf32>
      %35 = arith.addf %33, %34 : vector<8x1xf32>
      %36 = math.rsqrt %35 : vector<8x1xf32>
      %37 = vector.broadcast %36 : vector<8x1xf32> to vector<8x128xf32>
      %38 = arith.mulf %28, %37 : vector<8x128xf32>
      %c0_20 = arith.constant 0 : index
      %c0_21 = arith.constant 0 : index
      %39 = vector.load %arg5[%c0_20, %c0_21] : memref<1x128xf32, #tpu.memory_space<vmem>>, vector<1x128xf32>
      %40 = vector.broadcast %39 : vector<1x128xf32> to vector<8x128xf32>
      %41 = arith.mulf %38, %40 : vector<8x128xf32>
      %c0_22 = arith.constant 0 : index
      %c0_23 = arith.constant 0 : index
      %42 = vector.load %arg6[%c0_22, %c0_23] : memref<1x128xf32, #tpu.memory_space<vmem>>, vector<1x128xf32>
      %43 = vector.broadcast %42 : vector<1x128xf32> to vector<8x128xf32>
      %44 = arith.addf %41, %43 : vector<8x128xf32>
      %45 = math.tanh %44 : vector<8x128xf32>
      %c0_24 = arith.constant 0 : index
      %c0_25 = arith.constant 0 : index
      %46 = vector.load %arg7[%c0_24, %c0_25] : memref<128x128xf32, #tpu.memory_space<vmem>>, vector<128x128xf32>
      %cst_26 = arith.constant dense<0.000000e+00> : vector<8x128xf32>
      %47 = tpu.matmul %45, %46, %cst_26 {dimension_numbers = #tpu.dot_dimension_numbers<[1], [0], [0], [1], [0, 0, 1, 1], [], []>} : vector<8x128xf32>, vector<128x128xf32>, vector<8x128xf32> -> vector<8x128xf32>
      %c0_27 = arith.constant 0 : index
      %c0_28 = arith.constant 0 : index
      %48 = vector.load %arg8[%c0_27, %c0_28] : memref<1x128xf32, #tpu.memory_space<vmem>>, vector<1x128xf32>
      %49 = vector.broadcast %48 : vector<1x128xf32> to vector<8x128xf32>
      %50 = arith.addf %47, %49 : vector<8x128xf32>
      %cst_29 = arith.constant 0.000000e+00 : f32
      %51 = vector.broadcast %cst_29 : f32 to vector<8x128xf32>
      %52 = arith.maximumf %50, %51 : vector<8x128xf32>
      %c0_30 = arith.constant 0 : index
      %c0_31 = arith.constant 0 : index
      %53 = vector.load %arg9[%c0_30, %c0_31] : memref<128x128xf32, #tpu.memory_space<vmem>>, vector<128x128xf32>
      %cst_32 = arith.constant dense<0.000000e+00> : vector<8x128xf32>
      %54 = tpu.matmul %52, %53, %cst_32 {dimension_numbers = #tpu.dot_dimension_numbers<[1], [0], [0], [1], [0, 0, 1, 1], [], []>} : vector<8x128xf32>, vector<128x128xf32>, vector<8x128xf32> -> vector<8x128xf32>
      %c0_33 = arith.constant 0 : index
      %c0_34 = arith.constant 0 : index
      %55 = vector.load %arg10[%c0_33, %c0_34] : memref<1x128xf32, #tpu.memory_space<vmem>>, vector<1x128xf32>
      %56 = vector.broadcast %55 : vector<1x128xf32> to vector<8x128xf32>
      %57 = arith.addf %54, %56 : vector<8x128xf32>
      %cst_35 = arith.constant 0.000000e+00 : f32
      %58 = vector.broadcast %cst_35 : f32 to vector<8x128xf32>
      %59 = arith.maximumf %57, %58 : vector<8x128xf32>
      %c0_36 = arith.constant 0 : index
      %c0_37 = arith.constant 0 : index
      %60 = vector.load %arg11[%c0_36, %c0_37] : memref<1x128xf32, #tpu.memory_space<vmem>>, vector<1x128xf32>
      %61 = vector.broadcast %60 : vector<1x128xf32> to vector<8x128xf32>
      %62 = arith.mulf %59, %61 : vector<8x128xf32>
      %cst_38 = arith.constant dense<0.000000e+00> : vector<8xf32>
      %63 = vector.multi_reduction <add>, %62, %cst_38 [1] : vector<8x128xf32> to vector<8xf32>
      %64 = vector.shape_cast %63 : vector<8xf32> to vector<8x1xf32>
      %c0_39 = arith.constant 0 : index
      %c0_40 = arith.constant 0 : index
      %65 = vector.load %arg12[%c0_39, %c0_40] : memref<1x128xf32, #tpu.memory_space<vmem>>, vector<1x128xf32>
      %66 = vector.broadcast %64 : vector<8x1xf32> to vector<8x128xf32>
      %67 = vector.broadcast %65 : vector<1x128xf32> to vector<8x128xf32>
      %68 = arith.addf %66, %67 : vector<8x128xf32>
      %c0_41 = arith.constant 0 : index
      %c0_42 = arith.constant 0 : index
      %69 = vector.load %arg13[%c0_41, %c0_42] : memref<8x128xf32, #tpu.memory_space<vmem>>, vector<8x128xf32>
      tpu.vector_store %arg13[%c0_41, %c0_42], %68 {strides = array<i32>} : memref<8x128xf32, #tpu.memory_space<vmem>>, vector<8x128xf32>,
    } else {
    }
    return
  }
  func.func @transform_0(%arg0: i32, %arg1: i32) -> (i32, i32) {
    %c0_i32 = arith.constant 0 : i32
    return %arg0, %arg1 : i32, i32
  }
  func.func @transform_1(%arg0: i32, %arg1: i32) -> (i32, i32) {
    %c0_i32 = arith.constant 0 : i32
    %c0_i32_0 = arith.constant 0 : i32
    return %arg1, %c0_i32 : i32, i32
  }
  func.func @transform_2(%arg0: i32, %arg1: i32) -> (i32, i32) {
    %c0_i32 = arith.constant 0 : i32
    %c0_i32_0 = arith.constant 0 : i32
    %c0_i32_1 = arith.constant 0 : i32
    return %c0_i32, %c0_i32_0 : i32, i32
  }
  func.func @transform_3(%arg0: i32, %arg1: i32) -> (i32, i32) {
    %c0_i32 = arith.constant 0 : i32
    %c0_i32_0 = arith.constant 0 : i32
    %c0_i32_1 = arith.constant 0 : i32
    return %c0_i32, %c0_i32_0 : i32, i32
  }
  func.func @transform_4(%arg0: i32, %arg1: i32) -> (i32, i32) {
    %c0_i32 = arith.constant 0 : i32
    %c0_i32_0 = arith.constant 0 : i32
    %c0_i32_1 = arith.constant 0 : i32
    return %c0_i32, %c0_i32_0 : i32, i32
  }
  func.func @transform_5(%arg0: i32, %arg1: i32) -> (i32, i32) {
    %c0_i32 = arith.constant 0 : i32
    %c0_i32_0 = arith.constant 0 : i32
    %c0_i32_1 = arith.constant 0 : i32
    return %c0_i32, %c0_i32_0 : i32, i32
  }
  func.func @transform_6(%arg0: i32, %arg1: i32) -> (i32, i32) {
    %c0_i32 = arith.constant 0 : i32
    %c0_i32_0 = arith.constant 0 : i32
    %c0_i32_1 = arith.constant 0 : i32
    return %c0_i32, %c0_i32_0 : i32, i32
  }
  func.func @transform_7(%arg0: i32, %arg1: i32) -> (i32, i32) {
    %c0_i32 = arith.constant 0 : i32
    %c0_i32_0 = arith.constant 0 : i32
    %c0_i32_1 = arith.constant 0 : i32
    return %c0_i32, %c0_i32_0 : i32, i32
  }
  func.func @transform_8(%arg0: i32, %arg1: i32) -> (i32, i32) {
    %c0_i32 = arith.constant 0 : i32
    %c0_i32_0 = arith.constant 0 : i32
    %c0_i32_1 = arith.constant 0 : i32
    return %c0_i32, %c0_i32_0 : i32, i32
  }
  func.func @transform_9(%arg0: i32, %arg1: i32) -> (i32, i32) {
    %c0_i32 = arith.constant 0 : i32
    %c0_i32_0 = arith.constant 0 : i32
    %c0_i32_1 = arith.constant 0 : i32
    return %c0_i32, %c0_i32_0 : i32, i32
  }
  func.func @transform_10(%arg0: i32, %arg1: i32) -> (i32, i32) {
    %c0_i32 = arith.constant 0 : i32
    %c0_i32_0 = arith.constant 0 : i32
    %c0_i32_1 = arith.constant 0 : i32
    return %c0_i32, %c0_i32_0 : i32, i32
  }
  func.func @transform_11(%arg0: i32, %arg1: i32) -> (i32, i32) {
    %c0_i32 = arith.constant 0 : i32
    %c0_i32_0 = arith.constant 0 : i32
    return %arg0, %c0_i32 : i32, i32
  }
}

</mosaic_0001>

<bundles_post_ra>
// kernel: tpu_custom_call.1
= control target key start
LH: loop header
LB: loop body
LE: loop exit
PB: predicated region body
PF: predicated region fallthrough
CT: control target
= control target key end

     0   :  { %16 = vsyncpa [#allocation4], 0  ;;  %s559_s0 = inlined_call_operand.hbm [shape: f32[8,128], index: 0, kind: input, shape index: {}]   ;;  %s560_s1 = inlined_call_operand.hbm [shape: f32[128,128], index: 1, kind: input, shape index: {}]   ;;  %s561_s2 = inlined_call_operand.vmem [shape: f32[1,128], index: 2, kind: input, shape index: {}]   ;;  %s562_s3 = inlined_call_operand.vmem [shape: f32[1,128], index: 3, kind: input, shape index: {}]   ;;  %s563_s4 = inlined_call_operand.vmem [shape: f32[1,128], index: 4, kind: input, shape index: {}]   ;;  %s564_s5 = inlined_call_operand.hbm [shape: f32[128,128], index: 5, kind: input, shape index: {}]   ;;  %s565_s6 = inlined_call_operand.vmem [shape: f32[1,128], index: 6, kind: input, shape index: {}]   ;;  %s566_s7 = inlined_call_operand.hbm [shape: f32[128,128], index: 7, kind: input, shape index: {}]   ;;  %s567_s8 = inlined_call_operand.vmem [shape: f32[1,128], index: 8, kind: input, shape index: {}]   ;;  %s568_s9 = inlined_call_operand.vmem [shape: f32[1,128], index: 9, kind: input, shape index: {}]   ;;  %s569_s10 = inlined_call_operand.vmem [shape: f32[1,128], index: 10, kind: input, shape index: {}]   ;;  %s570_s11 = inlined_call_operand.hbm [shape: f32[8,128], index: 11, kind: output, shape index: {}]  }
   0x1   :  { %17 = vsyncpa [#allocation7], 0 }
   0x2   :  { %18 = vsyncpa [#allocation10], 0  ;;  %s35_s19 = sshll.u32 %s560_s1, 4  ;;  %s36_s19 = int_to_ptr.hbm [resolvable:$true] %s35_s19 }
   0x3   :  { %19 = vsyncpa [#allocation5], 0  ;;  %s451_s20 = smov [#allocation6]   ;;  %s25_s24 = sshll.u32 %s559_s0, 4  ;;  %s26_s24 = int_to_ptr.hbm [resolvable:$true] %s25_s24 }
   0x4   :  { %s37_s21 = sshll.u32 %s451_s20, 4  ;;  %s452_s25 = smov 128   ;;  %s38_s21 = int_to_ptr.vmem [resolvable:$true] %s37_s21 }
   0x5   :  { %s453_s26 = smov 8   ;;  %s454_s27 = smov [#allocation3]  }
   0x6   :  { %43 = dma.hbm_to_vmem [thread:$0]  %s36_s19, 2048, %s38_s21, [#allocation7], %s452_s25, %s452_s25, %s453_s26  }
   0x7   :  { %s27_s28 = sshll.u32 %s454_s27, 4  ;;  %s54_s12 = sshll.u32 %s564_s5, 4  ;;  %s28_s28 = int_to_ptr.vmem [resolvable:$true] %s27_s28  ;;  %s55_s12 = int_to_ptr.hbm [resolvable:$true] %s54_s12 }
   0x8   :  { %30 = dma.hbm_to_vmem [thread:$0]  %s26_s24, 128, %s28_s28, [#allocation4]  }
   0x9   :  { %s69_s14 = sshll.u32 %s566_s7, 4  ;;  %s455_s15 = smov [#allocation8]   ;;  %s70_s14 = int_to_ptr.hbm [resolvable:$true] %s69_s14 }
   0xa   :  { %s56_s16 = sshll.u32 %s455_s15, 4  ;;  %s456_s0 = smov [#allocation9]   ;;  %s57_s16 = int_to_ptr.vmem [resolvable:$true] %s56_s16 }
   0xb   :  { %62 = dma.hbm_to_vmem [thread:$0]  %s55_s12, 2048, %s57_s16, [#allocation7], %s452_s25, %s452_s25, %s453_s26  }
   0xc   :  { %s71_s17 = sshll.u32 %s456_s0, 4  ;;  %s72_s17 = int_to_ptr.vmem [resolvable:$true] %s71_s17 }
   0xd   :  { %77 = dma.hbm_to_vmem [thread:$0]  %s70_s14, 2048, %s72_s17, [#allocation10], %s452_s25, %s452_s25, %s453_s26  }
   0xe   :  { %443 = dma.done.wait [#allocation4], 128  }
   0xf   :  { %444 = vsyncadd [#allocation4], 4294967168 }
  0x10   :  { %445 = dma.done.wait [#allocation7], 4096  }
  0x11   :  { %446 = vsyncadd [#allocation7], 4294963200 }
  0x12   :  { %447 = dma.done.wait [#allocation10], 2048  }
  0x13   :  { %448 = vsyncadd [#allocation10], 4294965248  ;;  %v122_v0 = vld [vmem:[#allocation6 + $0x78] sm:$0xff]  ;;  %v121_v1 = vld [vmem:[#allocation6 + $0x70] sm:$0xff]  ;;  %v154_v20 = vlaneseq  ;;  %s293_s30 = sshll.u32 %s570_s11, 4  ;;  %s294_s30 = int_to_ptr.hbm [resolvable:$true] %s293_s30 }
  0x14   :  { %123 = vmatpush.msra.mxu0 %v122_v0  ;;  %v120_v2 = vld [vmem:[#allocation6 + $0x68] sm:$0xff]  ;;  %v119_v3 = vld [vmem:[#allocation6 + $0x60] sm:$0xff]  ;;  %v118_v4 = vld [vmem:[#allocation6 + $0x58] sm:$0xff] }
  0x15   :  { %v117_v5 = vld [vmem:[#allocation6 + $0x50] sm:$0xff]  ;;  %v116_v6 = vld [vmem:[#allocation6 + $0x48] sm:$0xff]  ;;  %v115_v7 = vld [vmem:[#allocation6 + $0x40] sm:$0xff]  ;;  %v155_v21 = vand.u32 127, %v154_v20 }
  0x16   :  { %124 = vmatpush.msra.mxu0 %v121_v1  ;;  %v114_v8 = vld [vmem:[#allocation6 + $0x38] sm:$0xff]  ;;  %v113_v9 = vld [vmem:[#allocation6 + $0x30] sm:$0xff]  ;;  %v112_v10 = vld [vmem:[#allocation6 + $0x28] sm:$0xff] }
  0x17   :  { %v111_v11 = vld [vmem:[#allocation6 + $0x20] sm:$0xff]  ;;  %v110_v12 = vld [vmem:[#allocation6 + $0x18] sm:$0xff]  ;;  %v109_v13 = vld [vmem:[#allocation6 + $0x10] sm:$0xff]  ;;  %vm156_vm0 = vcmp.lt.s32.totalorder %v155_v21, 64 }
  0x18   :  { %125 = vmatpush.msra.mxu0 %v120_v2  ;;  %v108_v14 = vld [vmem:[#allocation6 + $0x8] sm:$0xff]  ;;  %v107_v15 = vld [vmem:[#allocation6] sm:$0xff]  ;;  %v106_v16 = vld [vmem:[#allocation3] sm:$0xff] }
  0x19   :  { %v312_v17 = vld [vmem:[%s561_s2] ss:$0 sm:$0xff]  ;;  %v205_v28 = vld [vmem:[#allocation8 + $0x70] sm:$0xff]  ;;  %v204_v29 = vld [vmem:[#allocation8 + $0x68] sm:$0xff] }
  0x1a   :  { %126 = vmatpush.msra.mxu0 %v119_v3  ;;  %v206_v27 = vld [vmem:[#allocation8 + $0x78] sm:$0xff]  ;;  %v203_v30 = vld [vmem:[#allocation8 + $0x60] sm:$0xff]  ;;  %v201_v32 = vld [vmem:[#allocation8 + $0x50] sm:$0xff] }
  0x1b   :  { %211 = vmatpush.msra.mxu1 %v206_v27  ;;  %v202_v31 = vld [vmem:[#allocation8 + $0x58] sm:$0xff]  ;;  %v200_v33 = vld [vmem:[#allocation8 + $0x48] sm:$0xff]  ;;  %v199_v34 = vld [vmem:[#allocation8 + $0x40] sm:$0xff] }
  0x1c   :  { %127 = vmatpush.msra.mxu0 %v118_v4  ;;  %v198_v35 = vld [vmem:[#allocation8 + $0x38] sm:$0xff]  ;;  %v197_v36 = vld [vmem:[#allocation8 + $0x30] sm:$0xff]  ;;  %v196_v37 = vld [vmem:[#allocation8 + $0x28] sm:$0xff] }
  0x1d   :  { %212 = vmatpush.msra.mxu1 %v205_v28  ;;  %v195_v38 = vld [vmem:[#allocation8 + $0x20] sm:$0xff]  ;;  %v194_v39 = vld [vmem:[#allocation8 + $0x18] sm:$0xff]  ;;  %v193_v40 = vld [vmem:[#allocation8 + $0x10] sm:$0xff] }
  0x1e   :  { %128 = vmatpush.msra.mxu0 %v117_v5  ;;  %v192_v41 = vld [vmem:[#allocation8 + $0x8] sm:$0xff]  ;;  %v191_v43 = vld [vmem:[#allocation8] sm:$0xff]  ;;  %v247_v46 = vld [vmem:[#allocation9 + $0x78] sm:$0xff] }
  0x1f   :  { %213 = vmatpush.msra.mxu1 %v204_v29  ;;  %v246_v47 = vld [vmem:[#allocation9 + $0x70] sm:$0xff]  ;;  %252 = vmatpush.msra.mxu2 %v247_v46  ;;  %v245_v48 = vld [vmem:[#allocation9 + $0x68] sm:$0xff]  ;;  %v244_v49 = vld [vmem:[#allocation9 + $0x60] sm:$0xff] }
  0x20   :  { %129 = vmatpush.msra.mxu0 %v116_v6  ;;  %v243_v50 = vld [vmem:[#allocation9 + $0x58] sm:$0xff]  ;;  %v242_v53 = vld [vmem:[#allocation9 + $0x50] sm:$0xff]  ;;  %v241_v55 = vld [vmem:[#allocation9 + $0x48] sm:$0xff] }
  0x21   :  { %214 = vmatpush.msra.mxu1 %v203_v30  ;;  %253 = vmatpush.msra.mxu2 %v246_v47  ;;  %v240_v57 = vld [vmem:[#allocation9 + $0x40] sm:$0xff]  ;;  %v239_v59 = vld [vmem:[#allocation9 + $0x38] sm:$0xff]  ;;  %v238_v61 = vld [vmem:[#allocation9 + $0x30] sm:$0xff] }
  0x22   :  { %130 = vmatpush.msra.mxu0 %v115_v7  ;;  %v313_v62 = vld [vmem:[%s562_s3] ss:$0 sm:$0xff]  ;;  %v237_v0 = vld [vmem:[#allocation9 + $0x28] sm:$0xff]  ;;  %v236_v3 = vld [vmem:[#allocation9 + $0x20] sm:$0xff] }
  0x23   :  { %215 = vmatpush.msra.mxu1 %v202_v31  ;;  %254 = vmatpush.msra.mxu2 %v245_v48  ;;  %v314_v2 = vld [vmem:[%s563_s4] ss:$0 sm:$0xff] }
  0x24   :  { %131 = vmatpush.msra.mxu0 %v114_v8  ;;  %v235_v5 = vld [vmem:[#allocation9 + $0x18] sm:$0xff]  ;;  %v234_v8 = vld [vmem:[#allocation9 + $0x10] sm:$0xff] }
  0x25   :  { %216 = vmatpush.msra.mxu1 %v201_v32  ;;  %255 = vmatpush.msra.mxu2 %v244_v49  ;;  %v318_v21 = vld [vmem:[%s569_s10] ss:$0 sm:$0xff] }
  0x26   :  { %132 = vmatpush.msra.mxu0 %v113_v9  ;;  %v233_v9 = vld [vmem:[#allocation9 + $0x8] sm:$0xff] }
  0x27   :  { %217 = vmatpush.msra.mxu1 %v200_v33  ;;  %256 = vmatpush.msra.mxu2 %v243_v50 }
  0x28   :  { %133 = vmatpush.msra.mxu0 %v112_v10  ;;  %v232_v10 = vld [vmem:[#allocation9] sm:$0xff] }
  0x29   :  { %218 = vmatpush.msra.mxu1 %v199_v34  ;;  %257 = vmatpush.msra.mxu2 %v242_v53 }
  0x2a   :  { %134 = vmatpush.msra.mxu0 %v111_v11  ;;  %v315_v11 = vld [vmem:[%s565_s6] ss:$0 sm:$0xff]  ;;  %s457_s6 = smov [#allocation11]  }
  0x2b   :  { %219 = vmatpush.msra.mxu1 %v198_v35  ;;  %258 = vmatpush.msra.mxu2 %v241_v55  ;;  %s291_s27 = sshll.u32 %s457_s6, 4  ;;  %s292_s27 = int_to_ptr.vmem [resolvable:$true] %s291_s27 }
  0x2c   :  { %135 = vmatpush.msra.mxu0 %v110_v12 }
  0x2d   :  { %220 = vmatpush.msra.mxu1 %v197_v36  ;;  %259 = vmatpush.msra.mxu2 %v240_v57 }
  0x2e   :  { %136 = vmatpush.msra.mxu0 %v109_v13 }
  0x2f   :  { %221 = vmatpush.msra.mxu1 %v196_v37  ;;  %260 = vmatpush.msra.mxu2 %v239_v59 }
  0x30   :  { %137 = vmatpush.msra.mxu0 %v108_v14 }
  0x31   :  { %222 = vmatpush.msra.mxu1 %v195_v38  ;;  %261 = vmatpush.msra.mxu2 %v238_v61 }
  0x32   :  { %138 = vmatpush.msra.mxu0 %v107_v15  ;;  %v316_v15 = vld [vmem:[%s567_s8] ss:$0 sm:$0xff] }
  0x33   :  { %139 = vmatmul.f32.vlgmr.msra.gmra.mxu0 %v106_v16  ;;  %223 = vmatpush.msra.mxu1 %v194_v39 }
  0x34   :  { %262 = vmatpush.msra.mxu2 %v237_v0 }
  0x35   :  { %224 = vmatpush.msra.mxu1 %v193_v40 }
  0x36   :  { %263 = vmatpush.msra.mxu2 %v236_v3 }
  0x37   :  { %225 = vmatpush.msra.mxu1 %v192_v41 }
  0x38   :  { %264 = vmatpush.msra.mxu2 %v235_v5 }
  0x39   :  { %226 = vmatpush.msra.mxu1 %v191_v43 }
  0x3a   :  { %265 = vmatpush.msra.mxu2 %v234_v8 }
  0x3c   :  { %266 = vmatpush.msra.mxu2 %v233_v9 }
  0x3e   :  { %267 = vmatpush.msra.mxu2 %v232_v10 }
  0xb0   :  { %v140_v18 = vpop.f32.mrf.mxu0 }
  0xb1   :  { %v153_v19 = vadd.f32 %v312_v17, %v140_v18  ;;  %v317_v18 = vld [vmem:[%s568_s9] ss:$0 sm:$0xff] }
  0xb3   :  { %157 = vadd.xlane.f32.xlu0 %v153_v19 }
 0x126   :  { %v158_v22 = vpop.xlane.xlu0 %157 }
 0x127   :  { %v159_v23 = vmul.f32 0.015625, %v158_v22 }
 0x129   :  { %v160_v24 = vsub.f32 %v153_v19, %v159_v23 }
 0x12b   :  { %v533_v25 = vsel %vm156_vm0, %v160_v24, 0.0 }
 0x12c   :  { %v164_v26 = vmul.f32 %v533_v25, %v533_v25 }
 0x12e   :  { %165 = vadd.xlane.f32.xlu0 %v164_v26 }
 0x1a1   :  { %v166_v42 = vpop.xlane.xlu0 %165 }
 0x1a2   :  { %v167_v44 = vmul.f32 0.015625, %v166_v42 }
 0x1a4   :  { %v168_v45 = vadd.f32 1e-05, %v167_v44 }
 0x1a6   :  { %319 = vrsqrt.f32 %v168_v45  ;;  %vm175_vm2 = vweird.f32 %v168_v45 }
 0x1ac   :  { %v320_v51 = vpop.eup %319 }
 0x1ad   :  { %v170_v52 = vmul.f32 %v320_v51, %v168_v45  ;;  %vm176_vm1 = vweird.f32 %v320_v51 }
 0x1ae   :  { %vm177_vm3 = vmor %vm175_vm2, %vm176_vm1 }
 0x1af   :  { %v171_v54 = vmul.f32 %v320_v51, %v170_v52 }
 0x1b1   :  { %v172_v56 = vmul.f32 0.5, %v171_v54 }
 0x1b3   :  { %v173_v58 = vsub.f32 1.5, %v172_v56 }
 0x1b5   :  { %v174_v60 = vmul.f32 %v320_v51, %v173_v58 }
 0x1b7   :  { %v178_v63 = vsel %vm177_vm3, %v320_v51, %v174_v60 }
 0x1b8   :  { %v179_v1 = vmul.f32 %v178_v63, %v533_v25 }
 0x1ba   :  { %v184_v4 = vmul.f32 %v313_v62, %v179_v1 }
 0x1bc   :  { %v189_v6 = vadd.f32 %v314_v2, %v184_v4 }
 0x1be   :  { %321 = vtanh.f32 %v189_v6 }
 0x1c4   :  { %v322_v7 = vpop.eup %321 }
 0x1c5   :  { %227 = vmatmul.f32.vlgmr.msra.gmra.mxu1 %v322_v7 }
 0x242   :  { %v228_v12 = vpop.f32.mrf.mxu1 }
 0x243   :  { %v229_v13 = vadd.f32 %v315_v11, %v228_v12 }
 0x245   :  { %v231_v14 = vmax.f32 %v229_v13, 0.0 }
 0x247   :  { %268 = vmatmul.f32.vlgmr.msra.gmra.mxu2 %v231_v14 }
 0x2ca   :  { %v269_v16 = vpop.f32.mrf.mxu2 }
 0x2cb   :  { %v270_v17 = vadd.f32 %v316_v15, %v269_v16 }
 0x2cd   :  { %v272_v19 = vmax.f32 %v270_v17, 0.0 }
 0x2cf   :  { %v277_v20 = vmul.f32 %v317_v18, %v272_v19 }
 0x2d1   :  { %278 = vadd.xlane.f32.xlu1 %v277_v20 }
 0x344   :  { %v279_v22 = vpop.xlane.xlu1 %278 }
 0x345   :  { %v284_v23 = vadd.f32 %v318_v21, %v279_v22 }
 0x347   :  { %285 = vst [vmem:[#allocation11] sm:$0xff] %v284_v23 }
 0x348   :  { %296 = dma.vmem_to_hbm [thread:$0]  %s292_s27, 128, %s294_s30, [#allocation5]  }
 0x349   :  { %449 = dma.done.wait [#allocation5], 128  }
 0x34a   :  { %450 = vsyncadd [#allocation5], 4294967168 }
 0x34b   :  { %301 = vsyncpa [#allocation4], 1 }
 0x34c   :  { %302 = vsyncpa [#allocation7], 1 }
 0x34d   :  { %303 = vsyncpa [#allocation10], 1 }
 0x34e   :  { %304 = vsyncpa [#allocation5], 1 }

</bundles_post_ra>
